<compile_context>
chip_gen: v7x
topology: tpu7x:2x2x1
jax: 0.10.0
libtpu: 0.0.40
codegen_flags: <defaults>
</compile_context>

<pallas_src>
import functools
import math

import jax
import jax.numpy as jnp
from jax import lax
from jax.experimental import pallas as pl
from jax.experimental.pallas import tpu as pltpu

LN_EPS = 1e-5
BN_EPS = 1e-5
_INV_SQRT2 = 1.0 / math.sqrt(2.0)


def _gelu_exact(x):
    # PyTorch nn.GELU() default: 0.5 * x * (1 + erf(x / sqrt(2)))
    return 0.5 * x * (1.0 + lax.erf(x * _INV_SQRT2))


def _round_up(x, m):
    return ((x + m - 1) // m) * m


def _residual_block_kernel(out_features, x_ref, wfused_ref, bfused_ref,
                           ln_g_ref, ln_b_ref, w2_ref, b2_ref, out_ref):
    x = x_ref[...]

    # --- fused first matmul: [h | sc] = x @ [w1 | ws] + [b1 | bs] ---
    # (shared LHS -> one lane-dense 2*out_features-wide MXU result)
    hs = jnp.dot(x, wfused_ref[...], preferred_element_type=jnp.float32) + bfused_ref[...]
    h = hs[:, :out_features]          # block branch after Linear1
    sc = hs[:, out_features:]         # shortcut branch

    # --- LayerNorm(out_features) over the feature axis (biased variance) ---
    mu = jnp.mean(h, axis=-1, keepdims=True)
    var = jnp.mean(jnp.square(h - mu), axis=-1, keepdims=True)
    h = (h - mu) * lax.rsqrt(var + LN_EPS) * ln_g_ref[...] + ln_b_ref[...]

    # --- GELU (exact, matches nn.GELU default) ---
    h = _gelu_exact(h)

    # --- Dropout(0.3): eval-mode semantics -> identity ---
    # TODO(synk): training-mode dropout (torch RNG) not reproduced; eval mode only.

    # --- Linear2 with eval-mode BatchNorm1d folded into (w2', b2') on host ---
    h = jnp.dot(h, w2_ref[...], preferred_element_type=jnp.float32) + b2_ref[...]

    # --- residual add + final GELU ---
    out_ref[...] = _gelu_exact(h + sc)


def residual_block(x, params, *, tile_m=256):
    """x: (N, in_features) f32. params: dict of 2-D f32 arrays (see init_params)."""
    n, in_features = x.shape
    out_features = params["w1"].shape[1]

    # ---- host-side parameter prep (exact transforms, eval mode) ----
    # Fold BatchNorm1d (running stats) into Linear2.
    bn_scale = params["bn_g"] / jnp.sqrt(params["bn_var"] + BN_EPS)          # (1, out)
    w2_f = params["w2"] * bn_scale                                           # per-output-column scale
    b2_f = (params["b2"] - params["bn_mean"]) * bn_scale + params["bn_b"]
    # Concatenate Linear1 and shortcut weights (shared LHS -> one matmul).
    w_fused = jnp.concatenate([params["w1"], params["ws"]], axis=1)          # (in, 2*out)
    b_fused = jnp.concatenate([params["b1"], params["bs"]], axis=1)          # (1, 2*out)

    # ---- batch tiling (pad N to a multiple of the tile) ----
    tm = min(tile_m, _round_up(n, 8))
    n_pad = _round_up(n, tm)
    x_p = jnp.pad(x, ((0, n_pad - n), (0, 0))) if n_pad != n else x
    grid = (n_pad // tm,)

    cost = pl.CostEstimate(
        flops=int(2 * n_pad * (in_features * 2 * out_features
                               + out_features * out_features)),
        transcendentals=int(2 * n_pad * out_features),   # two erf-GELUs
        bytes_accessed=int(4 * (n_pad * in_features
                                + in_features * 2 * out_features
                                + out_features * out_features
                                + 4 * out_features
                                + n_pad * out_features)),
    )

    out = pl.pallas_call(
        functools.partial(_residual_block_kernel, out_features),
        out_shape=jax.ShapeDtypeStruct((n_pad, out_features), jnp.float32),
        grid=grid,
        in_specs=[
            pl.BlockSpec((tm, in_features), lambda i: (i, 0)),           # x: tiled on batch
            pl.BlockSpec((in_features, 2 * out_features), lambda i: (0, 0)),  # [w1|ws] resident
            pl.BlockSpec((1, 2 * out_features), lambda i: (0, 0)),       # [b1|bs]
            pl.BlockSpec((1, out_features), lambda i: (0, 0)),           # ln_g
            pl.BlockSpec((1, out_features), lambda i: (0, 0)),           # ln_b
            pl.BlockSpec((out_features, out_features), lambda i: (0, 0)),  # w2 (BN folded)
            pl.BlockSpec((1, out_features), lambda i: (0, 0)),           # b2 (BN folded)
        ],
        out_specs=pl.BlockSpec((tm, out_features), lambda i: (i, 0)),
        compiler_params=pltpu.CompilerParams(
            dimension_semantics=("parallel",)),
        cost_estimate=cost,
    )(x_p, w_fused, b_fused, params["ln_g"], params["ln_b"], w2_f, b2_f)

    return out[:n] if n_pad != n else out


def init_params(key, in_features, out_features):
    """Deterministic PyTorch-style init. Linear weights stored as (in, out)."""
    k1, k2, k3, k4, k5, k6 = jax.random.split(key, 6)

    def linear_init(kw, kb, fan_in, fan_out):
        bound = 1.0 / math.sqrt(fan_in)
        w = jax.random.uniform(kw, (fan_in, fan_out), jnp.float32, -bound, bound)
        b = jax.random.uniform(kb, (1, fan_out), jnp.float32, -bound, bound)
        return w, b

    w1, b1 = linear_init(k1, k2, in_features, out_features)
    w2, b2 = linear_init(k3, k4, out_features, out_features)
    ws, bs = linear_init(k5, k6, in_features, out_features)

    return {
        "w1": w1, "b1": b1,
        "ln_g": jnp.ones((1, out_features), jnp.float32),
        "ln_b": jnp.zeros((1, out_features), jnp.float32),
        "w2": w2, "b2": b2,
        "bn_g": jnp.ones((1, out_features), jnp.float32),
        "bn_b": jnp.zeros((1, out_features), jnp.float32),
        "bn_mean": jnp.zeros((1, out_features), jnp.float32),
        "bn_var": jnp.ones((1, out_features), jnp.float32),
        "ws": ws, "bs": bs,
    }


def residual_block_ref(x, p):
    """Pure-JAX reference (un-fused, un-folded) for correctness checking."""
    h = x @ p["w1"] + p["b1"]
    mu = jnp.mean(h, axis=-1, keepdims=True)
    var = jnp.mean(jnp.square(h - mu), axis=-1, keepdims=True)
    h = (h - mu) / jnp.sqrt(var + LN_EPS) * p["ln_g"] + p["ln_b"]
    h = _gelu_exact(h)
    h = h @ p["w2"] + p["b2"]
    h = (h - p["bn_mean"]) / jnp.sqrt(p["bn_var"] + BN_EPS) * p["bn_g"] + p["bn_b"]
    sc = x @ p["ws"] + p["bs"]
    return _gelu_exact(h + sc)


if __name__ == "__main__":
    in_features, out_features = 32, 64

    key = jax.random.PRNGKey(0)
    kx, kp, kx2 = jax.random.split(key, 3)
    params = init_params(kp, in_features, out_features)

    # Small shape (single tile).
    batch = 8
    x = jax.random.normal(kx, (batch, in_features), jnp.float32)
    out = jax.block_until_ready(residual_block(x, params))
    ref = residual_block_ref(x, params)
    assert out.shape == (batch, out_features)
    assert jnp.allclose(out, ref, atol=1e-5, rtol=1e-5), "mismatch vs JAX reference (small)"

    # Larger, non-divisible batch to exercise tiling + padding + parallel grid.
    batch2 = 300
    x2 = jax.random.normal(kx2, (batch2, in_features), jnp.float32)
    out2 = jax.block_until_ready(residual_block(x2, params))
    ref2 = residual_block_ref(x2, params)
    assert out2.shape == (batch2, out_features)
    assert jnp.allclose(out2, ref2, atol=1e-5, rtol=1e-5), "mismatch vs JAX reference (tiled)"

    print("KERNEL_OK")
</pallas_src>

<mosaic_0001>
module attributes {stable_mosaic.version = 11 : i64} {
  func.func @_residual_block_kernel(%arg0: i32, %arg1: memref<8x32xf32, #tpu.memory_space<vmem>>, %arg2: memref<32x128xf32, #tpu.memory_space<vmem>>, %arg3: memref<1x128xf32, #tpu.memory_space<vmem>>, %arg4: memref<1x64xf32, #tpu.memory_space<vmem>>, %arg5: memref<1x64xf32, #tpu.memory_space<vmem>>, %arg6: memref<64x64xf32, #tpu.memory_space<vmem>>, %arg7: memref<1x64xf32, #tpu.memory_space<vmem>>, %arg8: memref<8x64xf32, #tpu.memory_space<vmem>>) attributes {dimension_semantics = [#tpu.dimension_semantics<parallel>], iteration_bounds = array<i64: 1>, scalar_prefetch = 0 : i64, scratch_operands = 0 : i64, tpu.core_type = #tpu.core_type<tc>, window_params = [{transform_indices = @transform_0, window_bounds = array<i64: 8, 32>}, {pipeline_mode = #tpu.pipeline_mode<synchronous>, transform_indices = @transform_1, window_bounds = array<i64: 32, 128>}, {pipeline_mode = #tpu.pipeline_mode<synchronous>, transform_indices = @transform_2, window_bounds = array<i64: 1, 128>}, {pipeline_mode = #tpu.pipeline_mode<synchronous>, transform_indices = @transform_3, window_bounds = array<i64: 1, 64>}, {pipeline_mode = #tpu.pipeline_mode<synchronous>, transform_indices = @transform_4, window_bounds = array<i64: 1, 64>}, {pipeline_mode = #tpu.pipeline_mode<synchronous>, transform_indices = @transform_5, window_bounds = array<i64: 64, 64>}, {pipeline_mode = #tpu.pipeline_mode<synchronous>, transform_indices = @transform_6, window_bounds = array<i64: 1, 64>}, {transform_indices = @transform_7, window_bounds = array<i64: 8, 64>}]} {
    %c0 = arith.constant 0 : index
    %c0_0 = arith.constant 0 : index
    %0 = vector.load %arg1[%c0, %c0_0] : memref<8x32xf32, #tpu.memory_space<vmem>>, vector<8x32xf32>
    %c0_1 = arith.constant 0 : index
    %c0_2 = arith.constant 0 : index
    %1 = vector.load %arg2[%c0_1, %c0_2] : memref<32x128xf32, #tpu.memory_space<vmem>>, vector<32x128xf32>
    %cst = arith.constant dense<0.000000e+00> : vector<8x128xf32>
    %2 = tpu.matmul %0, %1, %cst {dimension_numbers = #tpu.dot_dimension_numbers<[1], [0], [0], [1], [0, 0, 1, 1], [], []>} : vector<8x32xf32>, vector<32x128xf32>, vector<8x128xf32> -> vector<8x128xf32>
    %c0_3 = arith.constant 0 : index
    %c0_4 = arith.constant 0 : index
    %3 = vector.load %arg3[%c0_3, %c0_4] : memref<1x128xf32, #tpu.memory_space<vmem>>, vector<1x128xf32>
    %4 = vector.broadcast %3 : vector<1x128xf32> to vector<8x128xf32>
    %5 = arith.addf %2, %4 : vector<8x128xf32>
    %6 = vector.extract_strided_slice %5 {offsets = [0, 0], sizes = [8, 64], strides = [1, 1]} : vector<8x128xf32> to vector<8x64xf32>
    %7 = vector.extract_strided_slice %5 {offsets = [0, 64], sizes = [8, 64], strides = [1, 1]} : vector<8x128xf32> to vector<8x64xf32>
    %cst_5 = arith.constant dense<0.000000e+00> : vector<8xf32>
    %8 = vector.multi_reduction <add>, %6, %cst_5 [1] : vector<8x64xf32> to vector<8xf32>
    %9 = vector.shape_cast %8 : vector<8xf32> to vector<8x1xf32>
    %cst_6 = arith.constant 6.400000e+01 : f32
    %10 = vector.broadcast %cst_6 : f32 to vector<8x1xf32>
    %11 = arith.divf %9, %10 : vector<8x1xf32>
    %12 = vector.broadcast %11 : vector<8x1xf32> to vector<8x64xf32>
    %13 = arith.subf %6, %12 : vector<8x64xf32>
    %14 = arith.mulf %13, %13 : vector<8x64xf32>
    %cst_7 = arith.constant dense<0.000000e+00> : vector<8xf32>
    %15 = vector.multi_reduction <add>, %14, %cst_7 [1] : vector<8x64xf32> to vector<8xf32>
    %16 = vector.shape_cast %15 : vector<8xf32> to vector<8x1xf32>
    %cst_8 = arith.constant 6.400000e+01 : f32
    %17 = vector.broadcast %cst_8 : f32 to vector<8x1xf32>
    %18 = arith.divf %16, %17 : vector<8x1xf32>
    %19 = vector.broadcast %11 : vector<8x1xf32> to vector<8x64xf32>
    %20 = arith.subf %6, %19 : vector<8x64xf32>
    %cst_9 = arith.constant 9.99999974E-6 : f32
    %21 = vector.broadcast %cst_9 : f32 to vector<8x1xf32>
    %22 = arith.addf %18, %21 : vector<8x1xf32>
    %23 = math.rsqrt %22 : vector<8x1xf32>
    %24 = vector.broadcast %23 : vector<8x1xf32> to vector<8x64xf32>
    %25 = arith.mulf %20, %24 : vector<8x64xf32>
    %c0_10 = arith.constant 0 : index
    %c0_11 = arith.constant 0 : index
    %26 = vector.load %arg4[%c0_10, %c0_11] : memref<1x64xf32, #tpu.memory_space<vmem>>, vector<1x64xf32>
    %27 = vector.broadcast %26 : vector<1x64xf32> to vector<8x64xf32>
    %28 = arith.mulf %25, %27 : vector<8x64xf32>
    %c0_12 = arith.constant 0 : index
    %c0_13 = arith.constant 0 : index
    %29 = vector.load %arg5[%c0_12, %c0_13] : memref<1x64xf32, #tpu.memory_space<vmem>>, vector<1x64xf32>
    %30 = vector.broadcast %29 : vector<1x64xf32> to vector<8x64xf32>
    %31 = arith.addf %28, %30 : vector<8x64xf32>
    %cst_14 = arith.constant 5.000000e-01 : f32
    %32 = vector.broadcast %cst_14 : f32 to vector<8x64xf32>
    %33 = arith.mulf %32, %31 : vector<8x64xf32>
    %cst_15 = arith.constant 0.707106769 : f32
    %34 = vector.broadcast %cst_15 : f32 to vector<8x64xf32>
    %35 = arith.mulf %31, %34 : vector<8x64xf32>
    %36 = math.erf %35 : vector<8x64xf32>
    %cst_16 = arith.constant 1.000000e+00 : f32
    %37 = vector.broadcast %cst_16 : f32 to vector<8x64xf32>
    %38 = arith.addf %37, %36 : vector<8x64xf32>
    %39 = arith.mulf %33, %38 : vector<8x64xf32>
    %c0_17 = arith.constant 0 : index
    %c0_18 = arith.constant 0 : index
    %40 = vector.load %arg6[%c0_17, %c0_18] : memref<64x64xf32, #tpu.memory_space<vmem>>, vector<64x64xf32>
    %cst_19 = arith.constant dense<0.000000e+00> : vector<8x64xf32>
    %41 = tpu.matmul %39, %40, %cst_19 {dimension_numbers = #tpu.dot_dimension_numbers<[1], [0], [0], [1], [0, 0, 1, 1], [], []>} : vector<8x64xf32>, vector<64x64xf32>, vector<8x64xf32> -> vector<8x64xf32>
    %c0_20 = arith.constant 0 : index
    %c0_21 = arith.constant 0 : index
    %42 = vector.load %arg7[%c0_20, %c0_21] : memref<1x64xf32, #tpu.memory_space<vmem>>, vector<1x64xf32>
    %43 = vector.broadcast %42 : vector<1x64xf32> to vector<8x64xf32>
    %44 = arith.addf %41, %43 : vector<8x64xf32>
    %45 = arith.addf %44, %7 : vector<8x64xf32>
    %cst_22 = arith.constant 5.000000e-01 : f32
    %46 = vector.broadcast %cst_22 : f32 to vector<8x64xf32>
    %47 = arith.mulf %46, %45 : vector<8x64xf32>
    %cst_23 = arith.constant 0.707106769 : f32
    %48 = vector.broadcast %cst_23 : f32 to vector<8x64xf32>
    %49 = arith.mulf %45, %48 : vector<8x64xf32>
    %50 = math.erf %49 : vector<8x64xf32>
    %cst_24 = arith.constant 1.000000e+00 : f32
    %51 = vector.broadcast %cst_24 : f32 to vector<8x64xf32>
    %52 = arith.addf %51, %50 : vector<8x64xf32>
    %53 = arith.mulf %47, %52 : vector<8x64xf32>
    %c0_25 = arith.constant 0 : index
    %c0_26 = arith.constant 0 : index
    %54 = vector.load %arg8[%c0_25, %c0_26] : memref<8x64xf32, #tpu.memory_space<vmem>>, vector<8x64xf32>
    tpu.vector_store %arg8[%c0_25, %c0_26], %53 {strides = array<i32>} : memref<8x64xf32, #tpu.memory_space<vmem>>, vector<8x64xf32>,
    return
  }
  func.func @transform_0(%arg0: i32) -> (i32, i32) {
    %c0_i32 = arith.constant 0 : i32
    %c0_i32_0 = arith.constant 0 : i32
    return %arg0, %c0_i32 : i32, i32
  }
  func.func @transform_1(%arg0: i32) -> (i32, i32) {
    %c0_i32 = arith.constant 0 : i32
    %c0_i32_0 = arith.constant 0 : i32
    %c0_i32_1 = arith.constant 0 : i32
    return %c0_i32, %c0_i32_0 : i32, i32
  }
  func.func @transform_2(%arg0: i32) -> (i32, i32) {
    %c0_i32 = arith.constant 0 : i32
    %c0_i32_0 = arith.constant 0 : i32
    %c0_i32_1 = arith.constant 0 : i32
    return %c0_i32, %c0_i32_0 : i32, i32
  }
  func.func @transform_3(%arg0: i32) -> (i32, i32) {
    %c0_i32 = arith.constant 0 : i32
    %c0_i32_0 = arith.constant 0 : i32
    %c0_i32_1 = arith.constant 0 : i32
    return %c0_i32, %c0_i32_0 : i32, i32
  }
  func.func @transform_4(%arg0: i32) -> (i32, i32) {
    %c0_i32 = arith.constant 0 : i32
    %c0_i32_0 = arith.constant 0 : i32
    %c0_i32_1 = arith.constant 0 : i32
    return %c0_i32, %c0_i32_0 : i32, i32
  }
  func.func @transform_5(%arg0: i32) -> (i32, i32) {
    %c0_i32 = arith.constant 0 : i32
    %c0_i32_0 = arith.constant 0 : i32
    %c0_i32_1 = arith.constant 0 : i32
    return %c0_i32, %c0_i32_0 : i32, i32
  }
  func.func @transform_6(%arg0: i32) -> (i32, i32) {
    %c0_i32 = arith.constant 0 : i32
    %c0_i32_0 = arith.constant 0 : i32
    %c0_i32_1 = arith.constant 0 : i32
    return %c0_i32, %c0_i32_0 : i32, i32
  }
  func.func @transform_7(%arg0: i32) -> (i32, i32) {
    %c0_i32 = arith.constant 0 : i32
    %c0_i32_0 = arith.constant 0 : i32
    return %arg0, %c0_i32 : i32, i32
  }
}

</mosaic_0001>

<bundles_post_ra>
// kernel: tpu_custom_call.1
= control target key start
LH: loop header
LB: loop body
LE: loop exit
PB: predicated region body
PF: predicated region fallthrough
CT: control target
= control target key end

     0   :  { %12 = vsyncpa [#allocation3], 0  ;;  %s601_s0 = inlined_call_operand.hbm [shape: f32[8,32], index: 0, kind: input, shape index: {}]   ;;  %s602_s1 = inlined_call_operand.hbm [shape: f32[32,128], index: 1, kind: input, shape index: {}]   ;;  %s603_s2 = inlined_call_operand.vmem [shape: f32[1,128], index: 2, kind: input, shape index: {}]   ;;  %s604_s3 = inlined_call_operand.vmem [shape: f32[1,64], index: 3, kind: input, shape index: {}]   ;;  %s605_s4 = inlined_call_operand.vmem [shape: f32[1,64], index: 4, kind: input, shape index: {}]   ;;  %s606_s5 = inlined_call_operand.hbm [shape: f32[64,64], index: 5, kind: input, shape index: {}]   ;;  %s607_s6 = inlined_call_operand.vmem [shape: f32[1,64], index: 6, kind: input, shape index: {}]   ;;  %s608_s7 = inlined_call_operand.hbm [shape: f32[8,64], index: 7, kind: output, shape index: {}]  }
   0x1   :  { %13 = vsyncpa [#allocation6], 0 }
   0x2   :  { %14 = vsyncpa [#allocation4], 0  ;;  %s481_s24 = smov [#allocation5]   ;;  %s387_s28 = scalar_lea.hbm %s602_s1, 512 }
   0x3   :  { %s30_s25 = sshll.u32 %s481_s24, 4  ;;  %p388_p0 = scmp.ne.s32.totalorder %s602_s1, %s387_s28  ;;  %s31_s25 = int_to_ptr.vmem [resolvable:$true] %s30_s25 }
   0x4   :  { %p391_p1 = scmp.lt.u32.totalorder %s387_s28, %s602_s1 }
   0x6   :  { %p393_p2 = pnand %p391_p1, %p388_p0 }
   0x8   :  { %396 = shalt.err (!%p393_p2)
}
   0x9   :  { %s397_s10 = scalar_lea.vmem %s31_s25, 512  ;;  %p402_p4 = scmp.lt.s32.totalorder %s31_s25, %s31_s25 }
   0xa   :  { %p398_p3 = scmp.ne.s32.totalorder %s31_s25, %s397_s10  ;;  %p403_p5 = scmp.lt.s32.totalorder %s397_s10, %s397_s10 }
   0xc   :  { %p404_p6 = por %p403_p5, %p402_p4 }
   0xe   :  { %p405_p7 = pnand %p404_p6, %p398_p3 }
  0x10   :  { %408 = shalt.err (!%p405_p7)
}
  0x11   :  { %s482_s11 = smov 128   ;;  %s483_s12 = smov 8  }
  0x12   :  { %36 = dma.hbm_to_vmem [thread:$0]  %s602_s1, 512, %s31_s25, [#allocation6], %s482_s11, %s482_s11, %s483_s12  }
  0x13   :  { %s484_s15 = smov [#allocation2]   ;;  %s485_s17 = smov [#allocation7]  }
  0x14   :  { %s21_s16 = sshll.u32 %s484_s15, 4  ;;  %s48_s18 = sshll.u32 %s485_s17, 4  ;;  %s22_s16 = int_to_ptr.vmem [resolvable:$true] %s21_s16  ;;  %s49_s18 = int_to_ptr.vmem [resolvable:$true] %s48_s18 }
  0x15   :  { %s409_s21 = scalar_lea.hbm %s601_s0, 128 }
  0x16   :  { %p410_p8 = scmp.ne.s32.totalorder %s601_s0, %s409_s21  ;;  %p413_p9 = scmp.lt.u32.totalorder %s409_s21, %s601_s0 }
  0x18   :  { %p415_p10 = pnand %p413_p9, %p410_p8 }
  0x1a   :  { %418 = shalt.err (!%p415_p10)
}
  0x1b   :  { %s419_s1 = scalar_lea.vmem %s22_s16, 128  ;;  %p424_p12 = scmp.lt.s32.totalorder %s22_s16, %s22_s16 }
  0x1c   :  { %p420_p11 = scmp.ne.s32.totalorder %s22_s16, %s419_s1  ;;  %p425_p13 = scmp.lt.s32.totalorder %s419_s1, %s419_s1 }
  0x1e   :  { %p426_p0 = por %p425_p13, %p424_p12 }
  0x20   :  { %p427_p1 = pnand %p426_p0, %p420_p11 }
  0x22   :  { %430 = shalt.err (!%p427_p1)
}
  0x23   :  { %24 = dma.hbm_to_vmem [thread:$0]  %s601_s0, 128, %s22_s16, [#allocation3]  }
  0x24   :  { %s431_s30 = scalar_lea.hbm %s606_s5, 1024 }
  0x25   :  { %p432_p2 = scmp.ne.s32.totalorder %s606_s5, %s431_s30  ;;  %p435_p3 = scmp.lt.u32.totalorder %s431_s30, %s606_s5 }
  0x27   :  { %p437_p4 = pnand %p435_p3, %p432_p2 }
  0x29   :  { %440 = shalt.err (!%p437_p4)
}
  0x2a   :  { %s441_s14 = scalar_lea.vmem %s49_s18, 1024  ;;  %p446_p6 = scmp.lt.s32.totalorder %s49_s18, %s49_s18 }
  0x2b   :  { %p442_p5 = scmp.ne.s32.totalorder %s49_s18, %s441_s14  ;;  %p447_p7 = scmp.lt.s32.totalorder %s441_s14, %s441_s14 }
  0x2d   :  { %p448_p8 = por %p447_p7, %p446_p6 }
  0x2f   :  { %p449_p9 = pnand %p448_p8, %p442_p5 }
  0x31   :  { %452 = shalt.err (!%p449_p9)
}
  0x32   :  { %54 = dma.hbm_to_vmem [thread:$0]  %s606_s5, 1024, %s49_s18, [#allocation6], %s482_s11, %s482_s11, %s483_s12  }
  0x33   :  { %475 = dma.done.wait [#allocation3], 128  }
  0x34   :  { %476 = vsyncadd [#allocation3], 4294967168 }
  0x35   :  { %477 = dma.done.wait [#allocation6], 1536  }
  0x36   :  { %478 = vsyncadd [#allocation6], 4294965760  ;;  %v486_v0 = vmov 0.0|0.0   ;;  %vm487_vm0 = vmmov 0   ;;  %v488_v1 = vmov 0.0   ;;  %v67_v2 = vld [vmem:[#allocation5] sm:$0xff] }
  0x37   :  { %353 = vmatprep.subr.bf16.mxu0 %v486_v0  ;;  %331 = vmatprep.mubr.msk.f32.mxu0 %vm487_vm0, %v488_v1  ;;  %v68_v3 = vld [vmem:[#allocation5 + $0x8] sm:$0xff]  ;;  %v69_v4 = vld [vmem:[#allocation5 + $0x10] sm:$0xff]  ;;  %v70_v6 = vld [vmem:[#allocation5 + $0x18] sm:$0xff]  ;;  %vm78_vm1 = vcmask 261120   ;;  %vm152_vm2 = vcmask 523264   ;;  %s489_s12 = smov 64  }
  0x38   :  { %359 = vmatprep.subr.bf16.mxu1 %v486_v0  ;;  %350 = vmatprep.mubr.msk.f32.mxu1 %vm487_vm0, %v488_v1  ;;  %v354_v5 = vpack.c.bf16 %v68_v3, %v67_v2  ;;  %v357_v7 = vpack.c.bf16 %v70_v6, %v69_v4  ;;  %v66_v8 = vld [vmem:[#allocation2] sm:$0xff]  ;;  %v188_v19 = vld [vmem:[#allocation7] sm:$0xff]  ;;  %v189_v20 = vld [vmem:[#allocation7 + $0x8] sm:$0xff] }
  0x39   :  { %v303_v9 = vld [vmem:[%s603_s2] ss:$0 sm:$0xff]  ;;  %v190_v21 = vld [vmem:[#allocation7 + $0x10] sm:$0xff]  ;;  %v360_v22 = vpack.c.bf16 %v189_v20, %v188_v19  ;;  %v192_v25 = vld [vmem:[#allocation7 + $0x20] sm:$0xff] }
  0x3a   :  { %355 = vmatpush3.bf16.msra.mxu0 %v354_v5  ;;  %v191_v23 = vld [vmem:[#allocation7 + $0x18] sm:$0xff]  ;;  %v193_v26 = vld [vmem:[#allocation7 + $0x28] sm:$0xff]  ;;  %v194_v28 = vld [vmem:[#allocation7 + $0x30] sm:$0xff] }
  0x3b   :  { %356 = vmatprep.subr.bf16.mxu0 %v486_v0  ;;  %361 = vmatpush3.bf16.msra.mxu1 %v360_v22  ;;  %v363_v24 = vpack.c.bf16 %v191_v23, %v190_v21  ;;  %v366_v27 = vpack.c.bf16 %v193_v26, %v192_v25  ;;  %v195_v29 = vld [vmem:[#allocation7 + $0x38] sm:$0xff] }
  0x3c   :  { %362 = vmatprep.subr.bf16.mxu1 %v486_v0  ;;  %v369_v30 = vpack.c.bf16 %v195_v29, %v194_v28  ;;  %v305_v35 = vld [vmem:[%s604_s3] ss:$0 sm:$0xff]  ;;  %s490_s3 = smov [#allocation8]  }
  0x3d   :  { %v306_v37 = vld [vmem:[%s605_s4] ss:$0 sm:$0xff]  ;;  %s293_s4 = sshll.u32 %s490_s3, 4  ;;  %s294_s4 = int_to_ptr.vmem [resolvable:$true] %s293_s4 }
  0x3e   :  { %358 = vmatpush3.bf16.msra.mxu0 %v357_v7  ;;  %v307_v45 = vld [vmem:[%s607_s6] ss:$0 sm:$0xff]  ;;  %s453_s21 = scalar_lea.vmem %s294_s4, 128  ;;  %p458_p11 = scmp.lt.s32.totalorder %s294_s4, %s294_s4 }
  0x3f   :  { %364 = vmatpush3.bf16.msra.mxu1 %v363_v24  ;;  %p454_p10 = scmp.ne.s32.totalorder %s294_s4, %s453_s21  ;;  %p459_p12 = scmp.lt.s32.totalorder %s453_s21, %s453_s21 }
  0x40   :  { %365 = vmatprep.subr.bf16.mxu1 %v486_v0 }
  0x41   :  { %332 = vmatmul.mubr.msk.f32.vlgmr.msra.gmra.mrb[0].mxu0 %vm78_vm1, %v66_v8  ;;  %p460_p13 = por %p459_p12, %p458_p11 }
  0x43   :  { %367 = vmatpush3.bf16.msra.mxu1 %v366_v27  ;;  %p461_p0 = pnand %p460_p13, %p454_p10 }
  0x44   :  { %368 = vmatprep.subr.bf16.mxu1 %v486_v0 }
  0x47   :  { %370 = vmatpush3.bf16.msra.mxu1 %v369_v30 }
 0x114   :  { %v148_v10 = vpop.f32.mrb[0].mxu0 }
 0x115   :  { %v149_v11 = vadd.f32 %v303_v9, %v148_v10  ;;  %v333_v12 = vpop.f32.mrb[1].mxu0 }
 0x117   :  { %277 = vrot.lane.b32.xlu1 %v149_v11, %s489_s12  ;;  %v153_v13 = vsel %vm152_vm2, %v149_v11, 0.0 }
 0x118   :  { %154 = vadd.xlane.f32.xlu0 %v153_v13 }
 0x189   :  { %v278_v49 = vpop.permute.xlu1 %277 }
 0x1a5   :  { %v155_v14 = vpop.xlane.xlu0 %154 }
 0x1a6   :  { %v157_v15 = vmul.f32 0.015625, %v155_v14 }
 0x1a8   :  { %v158_v16 = vsub.f32 %v149_v11, %v157_v15 }
 0x1aa   :  { %v159_v17 = vmul.f32 %v158_v16, %v158_v16 }
 0x1ac   :  { %v160_v18 = vsel %vm152_vm2, %v159_v17, 0.0 }
 0x1ad   :  { %161 = vadd.xlane.f32.xlu0 %v160_v18 }
 0x23a   :  { %v162_v31 = vpop.xlane.xlu0 %161 }
 0x23b   :  { %v163_v32 = vmul.f32 0.015625, %v162_v31 }
 0x23d   :  { %v164_v33 = vadd.f32 1e-05, %v163_v32 }
 0x23f   :  { %381 = vrsqrt.f32 %v164_v33 }
 0x249   :  { %v382_v34 = vpop.eup %381 }
 0x24a   :  { %v166_v36 = vmul.f32 %v382_v34, %v158_v16 }
 0x24c   :  { %v174_v38 = vmul.f32 %v305_v35, %v166_v36 }
 0x24e   :  { %v182_v39 = vadd.f32 %v306_v37, %v174_v38 }
 0x250   :  { %v184_v40 = vmul.f32 0.70710677, %v182_v39  ;;  %v183_v42 = vmul.f32 0.5, %v182_v39 }
 0x252   :  { %383 = verf.f32 %v184_v40 }
 0x25c   :  { %v384_v41 = vpop.eup %383 }
 0x25d   :  { %v186_v43 = vadd.f32 1.0, %v384_v41 }
 0x25f   :  { %v187_v44 = vmul.f32 %v186_v43, %v183_v42 }
 0x261   :  { %351 = vmatmul.mubr.msk.f32.vlgmr.msra.gmra.mrb[0].mxu1 %vm152_vm2, %v187_v44 }
 0x334   :  { %v272_v46 = vpop.f32.mrb[0].mxu1 }
 0x335   :  { %v273_v47 = vadd.f32 %v307_v45, %v272_v46  ;;  %v352_v48 = vpop.f32.mrb[1].mxu1 }
 0x337   :  { %v280_v50 = vadd.f32 %v278_v49, %v273_v47 }
 0x339   :  { %v282_v51 = vmul.f32 0.70710677, %v280_v50  ;;  %v281_v53 = vmul.f32 0.5, %v280_v50 }
 0x33b   :  { %385 = verf.f32 %v282_v51 }
 0x345   :  { %v386_v52 = vpop.eup %385 }
 0x346   :  { %v284_v54 = vadd.f32 1.0, %v386_v52 }
 0x348   :  { %v285_v55 = vmul.f32 %v284_v54, %v281_v53 }
 0x34a   :  { %286 = vst.msk [vmem:[#allocation8] sm:$0xff] %vm152_vm2, %v285_v55 }
 0x34b   :  { %464 = shalt.err (!%p461_p0)
}
 0x34c   :  { %s465_s23 = scalar_lea.hbm %s608_s7, 128 }
 0x34d   :  { %p466_p1 = scmp.ne.s32.totalorder %s608_s7, %s465_s23  ;;  %p469_p2 = scmp.lt.u32.totalorder %s465_s23, %s608_s7 }
 0x34f   :  { %p471_p3 = pnand %p469_p2, %p466_p1 }
 0x351   :  { %474 = shalt.err (!%p471_p3)
}
 0x352   :  { %296 = dma.vmem_to_hbm [thread:$0]  %s294_s4, 128, %s608_s7, [#allocation4]  }
 0x353   :  { %479 = dma.done.wait [#allocation4], 128  }
 0x354   :  { %480 = vsyncadd [#allocation4], 4294967168 }
 0x355   :  { %300 = vsyncpa [#allocation3], 1 }
 0x356   :  { %301 = vsyncpa [#allocation6], 1 }
 0x357   :  { %302 = vsyncpa [#allocation4], 1 }

</bundles_post_ra>
